<compile_context>
chip_gen: v7x
topology: tpu7x:2x2x1
jax: 0.10.0
libtpu: 0.0.40
codegen_flags: <defaults>
</compile_context>

<pallas_src>
import functools

import jax
import jax.numpy as jnp
from jax.experimental import pallas as pl
from jax.experimental.pallas import tpu as pltpu

BN_EPS = 1e-5
DEFAULT_TILE_B = 256                       # v7x-safe default
DEFAULT_VMEM_LIMIT = 48 * 1024 * 1024      # fits v7x's 64 MiB physical VMEM


def _round_up(n, m):
    return (n + m - 1) // m * m


def _hw_defaults():
    """Pick (tile_b, vmem_limit) from the chip; conservative (v7x-safe) fallback."""
    tile_b, vmem_limit = DEFAULT_TILE_B, DEFAULT_VMEM_LIMIT
    try:
        cap = getattr(pltpu.get_tpu_info(), "vmem_capacity_bytes", None)
        if cap is not None and cap >= 100 * 1024 * 1024:   # v5e / v6e: 128 MiB physical
            tile_b, vmem_limit = 512, 100 * 1024 * 1024
    except Exception:
        pass
    return tile_b, vmem_limit


def linear_bn_stats_kernel(x_ref, w1_ref, h_ref, stats_ref, *, compute_dtype):
    """Pass 1 (per batch tile): h = x @ W1; stash h; emit per-tile sum(h), sum(h^2).

    stats_ref is a (1, 8, H) tile-indexed block: row 0 = sum(h), row 1 = sum(h*h),
    rows 2..7 zero-padded (8-row sublane group keeps the output block layout legal).
    """
    # In-kernel cast (VPU) hides under the MXU matmul; keeps x single-read from HBM.
    x = x_ref[...].astype(compute_dtype)
    h = jnp.dot(x, w1_ref[...], preferred_element_type=jnp.float32)
    h_ref[...] = h.astype(h_ref.dtype)

    sum_h = jnp.sum(h, axis=0, keepdims=True)         # (1, H), f32
    sum_sq = jnp.sum(h * h, axis=0, keepdims=True)    # (1, H), f32
    row = jax.lax.broadcasted_iota(jnp.int32, (8, 1), 0)
    stats_ref[0] = jnp.where(row == 0, sum_h, jnp.where(row == 1, sum_sq, 0.0))


def bn_relu_linear_kernel(h_ref, scale_ref, shift_ref, w2_ref, b2_ref, o_ref,
                          *, compute_dtype):
    """Pass 2 (per batch tile): folded-BN affine -> ReLU -> Linear(+bias)."""
    h = h_ref[...].astype(jnp.float32)
    h = h * scale_ref[...] + shift_ref[...]            # folded BatchNorm (f32 VPU)
    h = jnp.maximum(h, 0.0)                            # ReLU (f32 VPU)
    out = jnp.dot(h.astype(compute_dtype), w2_ref[...],
                  preferred_element_type=jnp.float32) + b2_ref[...]
    o_ref[...] = out.astype(o_ref.dtype)


def _resident_spec(block_shape, index_map, single_buffer):
    """Constant-index-map operand: single-buffer it to halve its VMEM footprint."""
    if single_buffer:
        return pl.BlockSpec(block_shape, index_map, pipeline_mode=pl.Buffered(1))
    return pl.BlockSpec(block_shape, index_map)


def _mlp_forward_impl(x, w1, gamma, beta, w2, b2, *, tile_b, vmem_limit_bytes,
                      compute_dtype, single_buffer_weights):
    B, d_in = x.shape
    hidden = w1.shape[0]
    d_out = w2.shape[0]
    out_dtype = x.dtype

    # Batch padding / tiling (16-row groups for 2-byte compute dtypes).
    pad_to = 16 if jnp.dtype(compute_dtype).itemsize == 2 else 8
    tile_b = _round_up(min(tile_b, _round_up(B, pad_to)), pad_to)
    b_pad = _round_up(B, tile_b)
    nb = b_pad // tile_b
    if b_pad != B:
        x = jnp.pad(x, ((0, b_pad - B), (0, 0)))   # zero rows -> h == 0, stats unaffected

    # Weights in MXU-friendly layout / dtype; BN params and bias stay f32.
    w1t = w1.T.astype(compute_dtype)                   # (d_in, hidden)
    w2t = w2.T.astype(compute_dtype)                   # (hidden, d_out)
    b2r = b2.reshape(1, d_out).astype(jnp.float32)

    bytes_c = jnp.dtype(compute_dtype).itemsize
    bytes_x = jnp.dtype(x.dtype).itemsize

    # ---- Pass 1: first Linear + per-tile BN partial statistics ------------------
    h_stash, stats = pl.pallas_call(
        functools.partial(linear_bn_stats_kernel, compute_dtype=compute_dtype),
        out_shape=(jax.ShapeDtypeStruct((b_pad, hidden), compute_dtype),
                   jax.ShapeDtypeStruct((nb, 8, hidden), jnp.float32)),
        grid=(nb,),
        in_specs=[
            pl.BlockSpec((tile_b, d_in), lambda i: (i, 0)),                    # streamed
            _resident_spec((d_in, hidden), lambda i: (0, 0),
                           single_buffer_weights),                            # W1 resident
        ],
        out_specs=(
            pl.BlockSpec((tile_b, hidden), lambda i: (i, 0)),                  # h stash
            pl.BlockSpec((1, 8, hidden), lambda i: (i, 0, 0)),                 # partial stats
        ),
        compiler_params=pltpu.CompilerParams(
            dimension_semantics=("parallel",),
            vmem_limit_bytes=vmem_limit_bytes),
        cost_estimate=pl.CostEstimate(
            flops=2 * b_pad * d_in * hidden,
            transcendentals=0,
            bytes_accessed=b_pad * d_in * bytes_x + d_in * hidden * bytes_c
            + b_pad * hidden * bytes_c + nb * 8 * hidden * 4),
    )(x, w1t)

    # ---- Fold BatchNorm batch statistics into per-feature scale/shift (tiny, O(H)).
    sum_h = jnp.sum(stats[:, 0, :], axis=0).reshape(1, hidden)
    sum_sq = jnp.sum(stats[:, 1, :], axis=0).reshape(1, hidden)
    mu = sum_h / B
    # Biased batch variance (matches BatchNorm1d training normalization); the clamp
    # guards catastrophic cancellation in E[h^2] - mu^2.
    var = jnp.maximum(sum_sq / B - mu * mu, 0.0)
    scale = gamma.reshape(1, hidden).astype(jnp.float32) * jax.lax.rsqrt(var + BN_EPS)
    shift = beta.reshape(1, hidden).astype(jnp.float32) - mu * scale

    # ---- Pass 2: folded BN + ReLU + second Linear --------------------------------
    out = pl.pallas_call(
        functools.partial(bn_relu_linear_kernel, compute_dtype=compute_dtype),
        out_shape=jax.ShapeDtypeStruct((b_pad, d_out), out_dtype),
        grid=(nb,),
        in_specs=[
            pl.BlockSpec((tile_b, hidden), lambda i: (i, 0)),                  # streamed h
            _resident_spec((1, hidden), lambda i: (0, 0), single_buffer_weights),
            _resident_spec((1, hidden), lambda i: (0, 0), single_buffer_weights),
            _resident_spec((hidden, d_out), lambda i: (0, 0), single_buffer_weights),
            _resident_spec((1, d_out), lambda i: (0, 0), single_buffer_weights),
        ],
        out_specs=pl.BlockSpec((tile_b, d_out), lambda i: (i, 0)),
        compiler_params=pltpu.CompilerParams(
            dimension_semantics=("parallel",),
            vmem_limit_bytes=vmem_limit_bytes),
        cost_estimate=pl.CostEstimate(
            flops=2 * b_pad * hidden * d_out,
            transcendentals=0,
            bytes_accessed=b_pad * hidden * bytes_c + hidden * d_out * bytes_c
            + (2 * hidden + d_out) * 4
            + b_pad * d_out * jnp.dtype(out_dtype).itemsize),
    )(h_stash, scale, shift, w2t, b2r)

    return out[:B]


def mlp_forward(x, w1, gamma, beta, w2, b2, *, tile_b=None, vmem_limit_bytes=None,
                compute_dtype=jnp.bfloat16):
    """BYOL MLP forward.  x: (B, d_in); w1: (hidden, d_in); w2: (d_out, hidden)
    (PyTorch Linear layout); gamma/beta: (hidden,); b2: (d_out,)."""
    hw_tile_b, hw_vmem = _hw_defaults()
    if tile_b is None:
        tile_b = hw_tile_b
    if vmem_limit_bytes is None:
        vmem_limit_bytes = hw_vmem
    try:
        return _mlp_forward_impl(x, w1, gamma, beta, w2, b2, tile_b=tile_b,
                                 vmem_limit_bytes=vmem_limit_bytes,
                                 compute_dtype=compute_dtype,
                                 single_buffer_weights=True)
    except Exception:
        # Fallback if this JAX build rejects pipeline_mode=pl.Buffered(1): use the
        # default double-buffered specs (costs extra weight VMEM, still correct).
        return _mlp_forward_impl(x, w1, gamma, beta, w2, b2, tile_b=tile_b,
                                 vmem_limit_bytes=vmem_limit_bytes,
                                 compute_dtype=compute_dtype,
                                 single_buffer_weights=False)


def _reference(x, w1, gamma, beta, w2, b2, compute_dtype=jnp.float32):
    """Pure-JAX reference mirroring PyTorch (training-mode BatchNorm1d)."""
    xc = x.astype(compute_dtype)
    h = jnp.dot(xc, w1.T.astype(compute_dtype), preferred_element_type=jnp.float32)
    mu = jnp.mean(h, axis=0, keepdims=True)
    var = jnp.mean((h - mu) ** 2, axis=0, keepdims=True)
    h = (h - mu) * jax.lax.rsqrt(var + BN_EPS) * gamma + beta
    h = jnp.maximum(h, 0.0)
    return jnp.dot(h.astype(compute_dtype), w2.T.astype(compute_dtype),
                   preferred_element_type=jnp.float32) + b2


if __name__ == "__main__":
    # Small shapes consistent with the module (scaled-down input_dim/hidden/output).
    # B=20 with small tile_b exercises multi-tile partial-stat reduction and padding.
    B, D_IN, HIDDEN, D_OUT = 20, 128, 256, 128

    key = jax.random.PRNGKey(0)
    kx, kw1, kw2, kb2, kg, kb = jax.random.split(key, 6)

    x = jax.random.normal(kx, (B, D_IN), dtype=jnp.float32)
    # Linear weights in PyTorch layout (out_features, in_features).
    w1 = jax.random.normal(kw1, (HIDDEN, D_IN), dtype=jnp.float32) * (1.0 / D_IN ** 0.5)
    w2 = jax.random.normal(kw2, (D_OUT, HIDDEN), dtype=jnp.float32) * (1.0 / HIDDEN ** 0.5)
    b2 = jax.random.normal(kb2, (D_OUT,), dtype=jnp.float32) * 0.1
    gamma = 1.0 + 0.1 * jax.random.normal(kg, (HIDDEN,), dtype=jnp.float32)
    beta = 0.1 * jax.random.normal(kb, (HIDDEN,), dtype=jnp.float32)

    # f32 MXU path: tight check against the f32 reference (3 batch tiles).
    out_f32 = mlp_forward(x, w1, gamma, beta, w2, b2, tile_b=8,
                          compute_dtype=jnp.float32)
    out_f32 = jax.block_until_ready(out_f32)
    ref_f32 = _reference(x, w1, gamma, beta, w2, b2)
    assert out_f32.shape == (B, D_OUT)
    assert jnp.allclose(out_f32, ref_f32, atol=1e-4, rtol=1e-4), "f32 kernel mismatch"

    # Default bf16 MXU path (v6e/v7x fast path): check against a bf16 reference and
    # a looser check against the f32 reference for overall drift (2 batch tiles).
    out_bf16 = mlp_forward(x, w1, gamma, beta, w2, b2, tile_b=16)
    out_bf16 = jax.block_until_ready(out_bf16)
    ref_bf16 = _reference(x, w1, gamma, beta, w2, b2, compute_dtype=jnp.bfloat16)
    assert jnp.allclose(out_bf16, ref_bf16, atol=3e-2, rtol=3e-2), "bf16 kernel mismatch"
    assert jnp.allclose(out_bf16, ref_f32, atol=1.5e-1, rtol=1.5e-1), "bf16 vs f32 drift"

    print("KERNEL_OK")
</pallas_src>

<mosaic_0001>
module attributes {stable_mosaic.version = 11 : i64} {
  func.func @linear_bn_stats_kernel(%arg0: i32, %arg1: memref<8x128xf32, #tpu.memory_space<vmem>>, %arg2: memref<128x256xf32, #tpu.memory_space<vmem>>, %arg3: memref<8x256xf32, #tpu.memory_space<vmem>>, %arg4: memref<1x8x256xf32, #tpu.memory_space<vmem>>) attributes {dimension_semantics = [#tpu.dimension_semantics<parallel>], iteration_bounds = array<i64: 3>, scalar_prefetch = 0 : i64, scratch_operands = 0 : i64, tpu.core_type = #tpu.core_type<tc>, window_params = [{transform_indices = @transform_0, window_bounds = array<i64: 8, 128>}, {pipeline_mode = #tpu.pipeline_mode<synchronous>, transform_indices = @transform_1, window_bounds = array<i64: 128, 256>}, {transform_indices = @transform_2, window_bounds = array<i64: 8, 256>}, {transform_indices = @transform_3, window_bounds = array<i64: 1, 8, 256>}]} {
    %c0 = arith.constant 0 : index
    %c0_0 = arith.constant 0 : index
    %0 = vector.load %arg1[%c0, %c0_0] : memref<8x128xf32, #tpu.memory_space<vmem>>, vector<8x128xf32>
    %c0_1 = arith.constant 0 : index
    %c0_2 = arith.constant 0 : index
    %1 = vector.load %arg2[%c0_1, %c0_2] : memref<128x256xf32, #tpu.memory_space<vmem>>, vector<128x256xf32>
    %cst = arith.constant dense<0.000000e+00> : vector<8x256xf32>
    %2 = tpu.matmul %0, %1, %cst {dimension_numbers = #tpu.dot_dimension_numbers<[1], [0], [0], [1], [0, 0, 1, 1], [], []>} : vector<8x128xf32>, vector<128x256xf32>, vector<8x256xf32> -> vector<8x256xf32>
    %c0_3 = arith.constant 0 : index
    %c0_4 = arith.constant 0 : index
    %3 = vector.load %arg3[%c0_3, %c0_4] : memref<8x256xf32, #tpu.memory_space<vmem>>, vector<8x256xf32>
    tpu.vector_store %arg3[%c0_3, %c0_4], %2 {strides = array<i32>} : memref<8x256xf32, #tpu.memory_space<vmem>>, vector<8x256xf32>,
    %cst_5 = arith.constant dense<0.000000e+00> : vector<256xf32>
    %4 = vector.multi_reduction <add>, %2, %cst_5 [0] : vector<8x256xf32> to vector<256xf32>
    %5 = vector.shape_cast %4 : vector<256xf32> to vector<1x256xf32>
    %6 = arith.mulf %2, %2 : vector<8x256xf32>
    %cst_6 = arith.constant dense<0.000000e+00> : vector<256xf32>
    %7 = vector.multi_reduction <add>, %6, %cst_6 [0] : vector<8x256xf32> to vector<256xf32>
    %8 = vector.shape_cast %7 : vector<256xf32> to vector<1x256xf32>
    %9 = tpu.iota {dimensions = array<i32: 0>} : vector<8x1xi32>
    %c0_i32 = arith.constant 0 : i32
    %10 = vector.broadcast %c0_i32 : i32 to vector<8x1xi32>
    %11 = arith.cmpi eq, %9, %10 : vector<8x1xi32>
    %c1_i32 = arith.constant 1 : i32
    %12 = vector.broadcast %c1_i32 : i32 to vector<8x1xi32>
    %13 = arith.cmpi eq, %9, %12 : vector<8x1xi32>
    %cst_7 = arith.constant 0.000000e+00 : f32
    %14 = vector.shape_cast %13 : vector<8x1xi1> to vector<8x1xi1>
    %15 = vector.broadcast %14 : vector<8x1xi1> to vector<8x256xi1>
    %16 = vector.shape_cast %8 : vector<1x256xf32> to vector<1x256xf32>
    %17 = vector.broadcast %16 : vector<1x256xf32> to vector<8x256xf32>
    %18 = vector.broadcast %cst_7 : f32 to vector<8x256xf32>
    %19 = arith.select %15, %17, %18 : vector<8x256xi1>, vector<8x256xf32>
    %20 = vector.shape_cast %11 : vector<8x1xi1> to vector<8x1xi1>
    %21 = vector.broadcast %20 : vector<8x1xi1> to vector<8x256xi1>
    %22 = vector.shape_cast %5 : vector<1x256xf32> to vector<1x256xf32>
    %23 = vector.broadcast %22 : vector<1x256xf32> to vector<8x256xf32>
    %24 = arith.select %21, %23, %19 : vector<8x256xi1>, vector<8x256xf32>
    %c0_8 = arith.constant 0 : index
    %c0_9 = arith.constant 0 : index
    %c0_10 = arith.constant 0 : index
    %25 = vector.load %arg4[%c0_8, %c0_9, %c0_10] : memref<1x8x256xf32, #tpu.memory_space<vmem>>, vector<1x8x256xf32>
    %26 = vector.shape_cast %25 : vector<1x8x256xf32> to vector<8x256xf32>
    %27 = vector.shape_cast %24 : vector<8x256xf32> to vector<1x8x256xf32>
    tpu.vector_store %arg4[%c0_8, %c0_9, %c0_10], %27 {strides = array<i32>} : memref<1x8x256xf32, #tpu.memory_space<vmem>>, vector<1x8x256xf32>,
    return
  }
  func.func @transform_0(%arg0: i32) -> (i32, i32) {
    %c0_i32 = arith.constant 0 : i32
    %c0_i32_0 = arith.constant 0 : i32
    return %arg0, %c0_i32 : i32, i32
  }
  func.func @transform_1(%arg0: i32) -> (i32, i32) {
    %c0_i32 = arith.constant 0 : i32
    %c0_i32_0 = arith.constant 0 : i32
    %c0_i32_1 = arith.constant 0 : i32
    return %c0_i32, %c0_i32_0 : i32, i32
  }
  func.func @transform_2(%arg0: i32) -> (i32, i32) {
    %c0_i32 = arith.constant 0 : i32
    %c0_i32_0 = arith.constant 0 : i32
    return %arg0, %c0_i32 : i32, i32
  }
  func.func @transform_3(%arg0: i32) -> (i32, i32, i32) {
    %c0_i32 = arith.constant 0 : i32
    %c0_i32_0 = arith.constant 0 : i32
    %c0_i32_1 = arith.constant 0 : i32
    return %arg0, %c0_i32, %c0_i32_0 : i32, i32, i32
  }
}

module attributes {stable_mosaic.version = 11 : i64} {
  func.func @linear_bn_stats_kernel(%arg0: i32, %arg1: memref<8x128xf32, #tpu.memory_space<vmem>>, %arg2: memref<128x256xf32, #tpu.memory_space<vmem>>, %arg3: memref<8x256xf32, #tpu.memory_space<vmem>>, %arg4: memref<1x8x256xf32, #tpu.memory_space<vmem>>) attributes {dimension_semantics = [#tpu.dimension_semantics<parallel>], iteration_bounds = array<i64: 3>, scalar_prefetch = 0 : i64, scratch_operands = 0 : i64, tpu.core_type = #tpu.core_type<tc>, window_params = [{transform_indices = @transform_0, window_bounds = array<i64: 8, 128>}, {pipeline_mode = #tpu.pipeline_mode<synchronous>, transform_indices = @transform_1, window_bounds = array<i64: 128, 256>}, {transform_indices = @transform_2, window_bounds = array<i64: 8, 256>}, {transform_indices = @transform_3, window_bounds = array<i64: 1, 8, 256>}]} {
    %c0 = arith.constant 0 : index
    %c0_0 = arith.constant 0 : index
    %0 = vector.load %arg1[%c0, %c0_0] : memref<8x128xf32, #tpu.memory_space<vmem>>, vector<8x128xf32>
    %c0_1 = arith.constant 0 : index
    %c0_2 = arith.constant 0 : index
    %1 = vector.load %arg2[%c0_1, %c0_2] : memref<128x256xf32, #tpu.memory_space<vmem>>, vector<128x256xf32>
    %cst = arith.constant dense<0.000000e+00> : vector<8x256xf32>
    %2 = tpu.matmul %0, %1, %cst {dimension_numbers = #tpu.dot_dimension_numbers<[1], [0], [0], [1], [0, 0, 1, 1], [], []>} : vector<8x128xf32>, vector<128x256xf32>, vector<8x256xf32> -> vector<8x256xf32>
    %c0_3 = arith.constant 0 : index
    %c0_4 = arith.constant 0 : index
    %3 = vector.load %arg3[%c0_3, %c0_4] : memref<8x256xf32, #tpu.memory_space<vmem>>, vector<8x256xf32>
    tpu.vector_store %arg3[%c0_3, %c0_4], %2 {strides = array<i32>} : memref<8x256xf32, #tpu.memory_space<vmem>>, vector<8x256xf32>,
    %cst_5 = arith.constant dense<0.000000e+00> : vector<256xf32>
    %4 = vector.multi_reduction <add>, %2, %cst_5 [0] : vector<8x256xf32> to vector<256xf32>
    %5 = vector.shape_cast %4 : vector<256xf32> to vector<1x256xf32>
    %6 = arith.mulf %2, %2 : vector<8x256xf32>
    %cst_6 = arith.constant dense<0.000000e+00> : vector<256xf32>
    %7 = vector.multi_reduction <add>, %6, %cst_6 [0] : vector<8x256xf32> to vector<256xf32>
    %8 = vector.shape_cast %7 : vector<256xf32> to vector<1x256xf32>
    %9 = tpu.iota {dimensions = array<i32: 0>} : vector<8x1xi32>
    %c0_i32 = arith.constant 0 : i32
    %10 = vector.broadcast %c0_i32 : i32 to vector<8x1xi32>
    %11 = arith.cmpi eq, %9, %10 : vector<8x1xi32>
    %c1_i32 = arith.constant 1 : i32
    %12 = vector.broadcast %c1_i32 : i32 to vector<8x1xi32>
    %13 = arith.cmpi eq, %9, %12 : vector<8x1xi32>
    %cst_7 = arith.constant 0.000000e+00 : f32
    %14 = vector.shape_cast %13 : vector<8x1xi1> to vector<8x1xi1>
    %15 = vector.broadcast %14 : vector<8x1xi1> to vector<8x256xi1>
    %16 = vector.shape_cast %8 : vector<1x256xf32> to vector<1x256xf32>
    %17 = vector.broadcast %16 : vector<1x256xf32> to vector<8x256xf32>
    %18 = vector.broadcast %cst_7 : f32 to vector<8x256xf32>
    %19 = arith.select %15, %17, %18 : vector<8x256xi1>, vector<8x256xf32>
    %20 = vector.shape_cast %11 : vector<8x1xi1> to vector<8x1xi1>
    %21 = vector.broadcast %20 : vector<8x1xi1> to vector<8x256xi1>
    %22 = vector.shape_cast %5 : vector<1x256xf32> to vector<1x256xf32>
    %23 = vector.broadcast %22 : vector<1x256xf32> to vector<8x256xf32>
    %24 = arith.select %21, %23, %19 : vector<8x256xi1>, vector<8x256xf32>
    %c0_8 = arith.constant 0 : index
    %c0_9 = arith.constant 0 : index
    %c0_10 = arith.constant 0 : index
    %25 = vector.load %arg4[%c0_8, %c0_9, %c0_10] : memref<1x8x256xf32, #tpu.memory_space<vmem>>, vector<1x8x256xf32>
    %26 = vector.shape_cast %25 : vector<1x8x256xf32> to vector<8x256xf32>
    %27 = vector.shape_cast %24 : vector<8x256xf32> to vector<1x8x256xf32>
    tpu.vector_store %arg4[%c0_8, %c0_9, %c0_10], %27 {strides = array<i32>} : memref<1x8x256xf32, #tpu.memory_space<vmem>>, vector<1x8x256xf32>,
    return
  }
  func.func @transform_0(%arg0: i32) -> (i32, i32) {
    %c0_i32 = arith.constant 0 : i32
    %c0_i32_0 = arith.constant 0 : i32
    return %arg0, %c0_i32 : i32, i32
  }
  func.func @transform_1(%arg0: i32) -> (i32, i32) {
    %c0_i32 = arith.constant 0 : i32
    %c0_i32_0 = arith.constant 0 : i32
    %c0_i32_1 = arith.constant 0 : i32
    return %c0_i32, %c0_i32_0 : i32, i32
  }
  func.func @transform_2(%arg0: i32) -> (i32, i32) {
    %c0_i32 = arith.constant 0 : i32
    %c0_i32_0 = arith.constant 0 : i32
    return %arg0, %c0_i32 : i32, i32
  }
  func.func @transform_3(%arg0: i32) -> (i32, i32, i32) {
    %c0_i32 = arith.constant 0 : i32
    %c0_i32_0 = arith.constant 0 : i32
    %c0_i32_1 = arith.constant 0 : i32
    return %arg0, %c0_i32, %c0_i32_0 : i32, i32, i32
  }
}

</mosaic_0001>

<bundles_post_ra>
// kernel: tpu_custom_call.1
= control target key start
LH: loop header
LB: loop body
LE: loop exit
PB: predicated region body
PF: predicated region fallthrough
CT: control target
= control target key end

     0   :  { %9 = vsyncpa [#allocation3], 0  ;;  %s1039_s0 = inlined_call_operand.hbm [shape: f32[24,128], index: 0, kind: input, shape index: {}]   ;;  %s1040_s1 = inlined_call_operand.hbm [shape: f32[128,256], index: 1, kind: input, shape index: {}]   ;;  %s1041_s2 = inlined_call_operand.hbm [shape: f32[24,256], index: 2, kind: output, shape index: {0}]   ;;  %s1042_s3 = inlined_call_operand.hbm [shape: f32[3,8,256], index: 3, kind: output, shape index: {1}]  }
   0x1   :  { %11 = vsyncpa [#allocation3 + $0x1], 0 }
   0x2   :  { %12 = vsyncpa [#allocation6], 0 }
   0x3   :  { %13 = vsyncpa [#allocation4], 0 }
   0x4   :  { %15 = vsyncpa [#allocation4 + $0x1], 0 }
   0x5   :  { %16 = vsyncpa [#allocation9], 0 }
   0x6   :  { %18 = vsyncpa [#allocation9 + $0x1], 0  ;;  %s811_s12 = smov 0   ;;  %s813_s13 = smov 0  }
   0x7   :  { %s815_s14 = smov 0   ;;  %s817_s15 = smov 0  }
   0x8 LB: > { %s832_s16 = sadd.s32 4294967295, %s782_s15   ;;  %s504_s17 = sadd.s32 4294967294, %s782_s15   ;;  %s782_s15 = sphi %s817_s15, %s1061_s15   ;;  %s778_s14 = sphi %s815_s14, %s1060_s14   ;;  %s774_s13 = sphi %s813_s13, %s1059_s13   ;;  %s770_s12 = sphi %s811_s12, %s1058_s12  }
   0x9   : > { %p44_p0 = scmp.ne.s32.totalorder %s774_s13, %s770_s12  ;;  %p1043_p1 = scmp.eq.s32.totalorder %s832_s16, 0 }
   0xa   : > { %p95_p3 = scmp.eq.s32.totalorder %s504_s17, 2  ;;  %p505_p5 = scmp.ge.s32.totalorder %s782_s15, 1 }
   0xb   : > { %p841_p4 = por %p1043_p1, %p44_p0  ;;  %p128_p7 = scmp.lt.s32.totalorder %s782_s15, 4 }
   0xc   : > { %p846_p6 = por %p95_p3, %p44_p0  ;;  %s784_s21 = smov [#allocation5]  }
   0xd   : > { %s1046_s18 = scalar_select %p841_p4, 1, 0 }
   0xe   : > { %s1047_s19 = scalar_select %p846_p6, 1, 0 }
   0xf   : > { %p851_p8 = pnand %p505_p5, %p128_p7  ;;  %s140_s22 = sshll.u32 %s784_s21, 4  ;;  %s141_s22 = int_to_ptr.vmem [resolvable:$true] %s140_s22 }
  0x10   : > { %s864_s24 = sadd.s32 1, %s782_s15   ;;  %s31_s25 = sadd.s32 1, %s778_s14 }
  0x11   : > { %s1048_s20 = scalar_select %p851_p8, 1, 0 }
  0x12   : > { %p567_p9 = pneg %p851_p8  ;;  %s28_s26 = ssub.s32 %s782_s15, %s864_s24 }
  0x13   : > { %s622_s29 = scalar_lea.hbm %s1040_s1, 4096 }
  0x14   : > { %p859_p10 = pnand %p567_p9, %p1043_p1  ;;  %p623_p11 = scmp.ne.s32.totalorder %s1040_s1, %s622_s29 }
  0x15   : > { %p629_p3 = scmp.lt.u32.totalorder %s622_s29, %s1040_s1 }
  0x16   : > { %p624_p12 = pneg %p859_p10 }
  0x18   : > { %p625_p13 = pnand %p624_p12, %p623_p11 }
  0x1a   : > { %p626_p0 = pneg %p625_p13 }
  0x1c   : > { %p631_p5 = pnand %p629_p3, %p626_p0 }
  0x1e   : > { %634 = shalt.err (!%p631_p5)
}
  0x1f   : > { %s635_s7 = scalar_lea.vmem %s141_s22, 4096  ;;  %p643_p2 = scmp.lt.s32.totalorder %s141_s22, %s141_s22 }
  0x20   : > { %p636_p7 = scmp.ne.s32.totalorder %s141_s22, %s635_s7  ;;  %p644_p6 = scmp.lt.s32.totalorder %s635_s7, %s635_s7 }
  0x22   : > { %p638_p9 = pnand %p636_p7, %p624_p12  ;;  %p645_p4 = por %p644_p6, %p643_p2 }
  0x24   : > { %p639_p1 = pneg %p638_p9 }
  0x26   : > { %p646_p8 = pnand %p645_p4, %p639_p1 }
  0x28   : > { %649 = shalt.err (!%p646_p8)
}
  0x29   : > { %s785_s8 = smov 256   ;;  %s786_s9 = smov 16  }
  0x2a   : > { %570 = dma.hbm_to_vmem [thread:$0]  (!%p859_p10), %s1040_s1, 4096, %s141_s22, [#allocation6], %s785_s8, %s785_s8, %s786_s9  }
  0x2b   : > { %p29_p11 = scmp.eq.s32.totalorder %s28_s26, 0  ;;  %p38_p2 = scmp.ne.s32.totalorder %s778_s14, %s774_s13 }
  0x2c   : > { %p39_p1 = scmp.eq.s32.totalorder %s782_s15, 0  ;;  %p583_p4 = scmp.lt.s32.totalorder %s782_s15, 3 }
  0x2d   : > { %s890_s17 = scalar_select %p29_p11, %s778_s14, %s31_s25  }
  0x2e   : > { %p40_p6 = por %p39_p1, %p38_p2  ;;  %p1050_p8 = scmp.eq.s32.totalorder %s832_s16, 2 }
  0x2f   : > { %s154_s27 = sand.u32 1, %s778_s14   ;;  %s509_s28 = sshll.u32 %s782_s15, 7 }
  0x30   : > { %p894_p12 = por %p1050_p8, %p38_p2  ;;  %s508_s29 = sshll.u32 %s154_s27, 3 }
  0x31   : > { %s903_s4 = scalar_lea.hbm %s1039_s0, %s509_s28  ;;  %s158_s22 = scalar_lea.vmem [#allocation2], %s508_s29 }
  0x32   : > { %s165_s25 = sshll.u32 %s158_s22, 4  ;;  %p905_p10 = pnand %p583_p4, %p40_p6  ;;  %s909_s25 = int_to_ptr.vmem [resolvable:$true] %s165_s25 }
  0x33   : > { %s155_s5 = scalar_lea.sflag [#allocation3], %s154_s27  ;;  %s650_s6 = scalar_lea.hbm %s903_s4, 128 }
  0x34   : > { %p651_p13 = scmp.ne.s32.totalorder %s903_s4, %s650_s6  ;;  %p652_p0 = pneg %p905_p10 }
  0x35   : > { %s655_s9 = scalar_lea.hbm %s1039_s0, 384  ;;  %p656_p7 = scmp.lt.u32.totalorder %s903_s4, %s1039_s0 }
  0x36   : > { %p653_p3 = pnand %p652_p0, %p651_p13  ;;  %p657_p9 = scmp.lt.u32.totalorder %s655_s9, %s650_s6 }
  0x37   : > { %p659_p2 = scmp.lt.u32.totalorder %s650_s6, %s903_s4 }
  0x38   : > { %p654_p5 = pneg %p653_p3  ;;  %p658_p11 = por %p657_p9, %p656_p7 }
  0x3a   : > { %p660_p1 = por %p659_p2, %p658_p11 }
  0x3c   : > { %p661_p4 = pnand %p660_p1, %p654_p5 }
  0x3e   : > { %664 = shalt.err (!%p661_p4)
}
  0x3f   : > { %s665_s27 = scalar_lea.vmem %s909_s25, 128  ;;  %s787_s28 = smov [#allocation2]  }
  0x40   : > { %p666_p6 = scmp.ne.s32.totalorder %s909_s25, %s665_s27  ;;  %s670_s29 = sshll.u32 %s787_s28, 4  ;;  %s671_s29 = int_to_ptr.vmem [resolvable:$false] %s670_s29 }
  0x41   : > { %s672_s23 = scalar_lea.vmem %s671_s29, 256  ;;  %p673_p3 = scmp.lt.s32.totalorder %s909_s25, %s671_s29 }
  0x42   : > { %p668_p8 = pnand %p666_p6, %p652_p0  ;;  %p674_p7 = scmp.lt.s32.totalorder %s672_s23, %s665_s27 }
  0x44   : > { %p669_p13 = pneg %p668_p8  ;;  %p675_p9 = por %p674_p7, %p673_p3 }
  0x46   : > { %p676_p11 = pnand %p675_p9, %p669_p13 }
  0x48   : > { %679 = shalt.err (!%p676_p11)
}
  0x49   : > { %574 = dma.hbm_to_vmem [thread:$0]  (!%p905_p10), %s903_s4, 128, %s909_s25, %s155_s5  }
  0x4a   : > { %p1053_p5 = scmp.ne.s32.totalorder %s1048_s20, 0 }
  0x4b   : > { %s939_s30 = sand.u32 (!%p1053_p5), 1, %s774_s13   ;;  %p1054_p0 = scmp.ne.s32.totalorder (!%p1053_p5), %s1046_s18, 0 }
  0x4c   : > { %174 = sbr.rel (%p1053_p5) target bundleno = 377 (0x179), region = 28  ;;  %s511_s22 = sshll.u32 (!%p1053_p5), %s939_s30, 3 }
  0x4d   : > { %s177_s6 = scalar_lea.sflag (!%p1053_p5), [#allocation3], %s939_s30  ;;  %s943_s7 = scalar_lea.vmem (!%p1053_p5), [#allocation2], %s511_s22 }
  0x53   : > { %753 = dma.done.wait (%p1054_p0), %s177_s6, 128  }
  0x54   : > { %755 = vsyncadd (%p1054_p0), %s177_s6, 4294967168  ;;  %p1055_p10 = scmp.eq.s32.totalorder %s832_s16, 0 }
  0x56   : > { %757 = dma.done.wait (%p1055_p10), [#allocation6], 4096   ;;  %p1056_p2 = pmov %p1055_p10 }
  0x57   : > { %v788_v0 = vmov 0.0   ;;  %v214_v1 = vld [vmem:[#allocation5 + $0x8] sm:$0xff]  ;;  %v216_v2 = vld [vmem:[#allocation5 + $0x18] sm:$0xff]  ;;  %v213_v3 = vld [vmem:[#allocation5] sm:$0xff]  ;;  %s513_s18 = sshll.u32 %s939_s30, 4  ;;  %s523_s20 = sshll.u32 %s832_s16, 8 }
  0x58   : > { %759 = vsyncadd (%p1056_p2), [#allocation6], 4294963200  ;;  %309 = vmatprep.mubr.f32.mxu0 %v788_v0  ;;  %v525_v4 = vpack.c.bf16 %v216_v2, %v214_v1  ;;  %v215_v5 = vld [vmem:[#allocation5 + $0x10] sm:$0xff]  ;;  %v218_v6 = vld [vmem:[#allocation5 + $0x28] sm:$0xff]  ;;  %s204_s4 = scalar_lea.vmem [#allocation7], %s513_s18  ;;  %s963_s8 = scalar_lea.hbm %s1041_s2, %s523_s20 }
  0x59   : > { %v220_v7 = vld [vmem:[#allocation5 + $0x38] sm:$0xff]  ;;  %v527_v8 = vpack.c.bf16 %v215_v5, %v213_v3  ;;  %v217_v10 = vld [vmem:[#allocation5 + $0x20] sm:$0xff]  ;;  %v219_v11 = vld [vmem:[#allocation5 + $0x30] sm:$0xff]  ;;  %s378_s25 = sshll.u32 %s204_s4, 4  ;;  %s359_s9 = scalar_lea.sflag [#allocation4], %s939_s30  ;;  %s965_s25 = int_to_ptr.vmem [resolvable:$true] %s378_s25 }
  0x5a   : > { %v529_v9 = vpack.c.bf16 %v220_v7, %v218_v6  ;;  %v222_v12 = vld [vmem:[#allocation5 + $0x48] sm:$0xff]  ;;  %526 = vmatprep.subr.bf16.mxu0 %v525_v4  ;;  %v224_v13 = vld [vmem:[#allocation5 + $0x58] sm:$0xff]  ;;  %v531_v14 = vpack.c.bf16 %v219_v11, %v217_v10  ;;  %v221_v16 = vld [vmem:[#allocation5 + $0x40] sm:$0xff]  ;;  %s680_s10 = scalar_lea.vmem %s965_s25, 256  ;;  %s789_s11 = smov [#allocation7]  }
  0x5b   : > { %528 = vmatpush1.bf16.msra.mxu0 %v527_v8  ;;  %v533_v15 = vpack.c.bf16 %v224_v13, %v222_v12  ;;  %v223_v17 = vld [vmem:[#allocation5 + $0x50] sm:$0xff]  ;;  %v226_v18 = vld [vmem:[#allocation5 + $0x68] sm:$0xff]  ;;  %v228_v19 = vld [vmem:[#allocation5 + $0x78] sm:$0xff]  ;;  %p681_p1 = scmp.ne.s32.totalorder %s965_s25, %s680_s10  ;;  %s684_s27 = sshll.u32 %s789_s11, 4  ;;  %s685_s27 = int_to_ptr.vmem [resolvable:$false] %s684_s27 }
  0x5c   : > { %530 = vmatprep.subr.bf16.mxu0 %v529_v9  ;;  %v535_v20 = vpack.c.bf16 %v223_v17, %v221_v16  ;;  %v537_v21 = vpack.c.bf16 %v228_v19, %v226_v18  ;;  %v225_v22 = vld [vmem:[#allocation5 + $0x60] sm:$0xff]  ;;  %v227_v23 = vld [vmem:[#allocation5 + $0x70] sm:$0xff]  ;;  %v230_v24 = vld [vmem:[#allocation5 + $0x88] sm:$0xff]  ;;  %s686_s28 = scalar_lea.vmem %s685_s27, 512  ;;  %p687_p8 = scmp.lt.s32.totalorder %s965_s25, %s685_s27 }
  0x5d   : > { %v232_v25 = vld [vmem:[#allocation5 + $0x98] sm:$0xff]  ;;  %v539_v26 = vpack.c.bf16 %v227_v23, %v225_v22  ;;  %v229_v28 = vld [vmem:[#allocation5 + $0x80] sm:$0xff]  ;;  %v231_v29 = vld [vmem:[#allocation5 + $0x90] sm:$0xff]  ;;  %p682_p4 = pnand %p681_p1, %p894_p12  ;;  %p688_p13 = scmp.lt.s32.totalorder %s686_s28, %s680_s10 }
  0x5e   : > { %v541_v27 = vpack.c.bf16 %v232_v25, %v230_v24  ;;  %v234_v30 = vld [vmem:[#allocation5 + $0xa8] sm:$0xff]  ;;  %v236_v31 = vld [vmem:[#allocation5 + $0xb8] sm:$0xff]  ;;  %v543_v32 = vpack.c.bf16 %v231_v29, %v229_v28  ;;  %v233_v34 = vld [vmem:[#allocation5 + $0xa0] sm:$0xff] }
  0x5f   : > { %532 = vmatpush1.bf16.msra.mxu0 %v531_v14  ;;  %v545_v33 = vpack.c.bf16 %v236_v31, %v234_v30  ;;  %v235_v35 = vld [vmem:[#allocation5 + $0xb0] sm:$0xff]  ;;  %v238_v36 = vld [vmem:[#allocation5 + $0xc8] sm:$0xff]  ;;  %v240_v37 = vld [vmem:[#allocation5 + $0xd8] sm:$0xff]  ;;  %p683_p6 = pneg %p682_p4  ;;  %p689_p3 = por %p688_p13, %p687_p8 }
  0x60   : > { %534 = vmatprep.subr.bf16.mxu0 %v533_v15  ;;  %v547_v38 = vpack.c.bf16 %v235_v35, %v233_v34  ;;  %v549_v39 = vpack.c.bf16 %v240_v37, %v238_v36  ;;  %v237_v40 = vld [vmem:[#allocation5 + $0xc0] sm:$0xff]  ;;  %v239_v41 = vld [vmem:[#allocation5 + $0xd0] sm:$0xff]  ;;  %v242_v42 = vld [vmem:[#allocation5 + $0xe8] sm:$0xff] }
  0x61   : > { %v244_v43 = vld [vmem:[#allocation5 + $0xf8] sm:$0xff]  ;;  %v551_v44 = vpack.c.bf16 %v239_v41, %v237_v40  ;;  %v241_v46 = vld [vmem:[#allocation5 + $0xe0] sm:$0xff]  ;;  %v243_v47 = vld [vmem:[#allocation5 + $0xf0] sm:$0xff]  ;;  %p690_p7 = pnand %p689_p3, %p683_p6 }
  0x62   : > { %v553_v45 = vpack.c.bf16 %v244_v43, %v242_v42  ;;  %v555_v48 = vpack.c.bf16 %v243_v47, %v241_v46  ;;  %v212_v49 = vld [vmem:[%s943_s7] sm:$0xff] }
  0x63   : > { %536 = vmatpush1.bf16.msra.mxu0 %v535_v20 }
  0x64   : > { %538 = vmatprep.subr.bf16.mxu0 %v537_v21 }
  0x67   : > { %540 = vmatpush1.bf16.msra.mxu0 %v539_v26 }
  0x68   : > { %542 = vmatprep.subr.bf16.mxu0 %v541_v27 }
  0x6b   : > { %544 = vmatpush1.bf16.msra.mxu0 %v543_v32 }
  0x6c   : > { %546 = vmatprep.subr.bf16.mxu0 %v545_v33 }
  0x6f   : > { %548 = vmatpush1.bf16.msra.mxu0 %v547_v38 }
  0x70   : > { %550 = vmatprep.subr.bf16.mxu0 %v549_v39 }
  0x73   : > { %552 = vmatpush1.bf16.msra.mxu0 %v551_v44 }
  0x74   : > { %554 = vmatprep.subr.bf16.mxu0 %v553_v45 }
  0x77   : > { %556 = vmatpush1.bf16.msra.mxu0 %v555_v48 }
  0x7a   : > { %310 = vmatmul.mubr.f32.vlgmr.msra.gmra.mrb[0].mxu0 %v212_v49 }
 0x14d   : > { %v311_v50 = vpop.f32.mrb[0].mxu0 }
 0x14e   : > { %316 = vst [vmem:[%s204_s4] sm:$0xff] %v311_v50  ;;  %v318_v51 = vrot.slane %v311_v50, 4  ;;  %v330_v52 = vmul.f32 %v311_v50, %v311_v50  ;;  %v313_v53 = vpop.f32.mrb[1].mxu0 }
 0x14f   : > { %317 = vst [vmem:[%s204_s4 + $0x8] sm:$0xff] %v313_v53  ;;  %v324_v54 = vrot.slane %v313_v53, 4  ;;  %v331_v55 = vmul.f32 %v313_v53, %v313_v53 }
 0x150   : > { %v319_v56 = vadd.f32 %v318_v51, %v311_v50  ;;  %v332_v57 = vrot.slane %v330_v52, 4 }
 0x151   : > { %693 = shalt.err (!%p690_p7)
}
 0x152   : > { %s694_s29 = scalar_lea.hbm %s963_s8, 256  ;;  %s698_s6 = scalar_lea.hbm %s1041_s2, 768 }
 0x153   : > { %p695_p9 = scmp.ne.s32.totalorder %s963_s8, %s694_s29  ;;  %p699_p0 = scmp.lt.u32.totalorder %s963_s8, %s1041_s2 }
 0x154   : > { %p700_p10 = scmp.lt.u32.totalorder %s698_s6, %s694_s29  ;;  %p702_p1 = scmp.lt.u32.totalorder %s694_s29, %s963_s8 }
 0x155   : > { %p696_p11 = pnand %p695_p9, %p894_p12 }
 0x156   : > { %p701_p2 = por %p700_p10, %p699_p0 }
 0x157   : > { %p697_p5 = pneg %p696_p11 }
 0x158   : > { %p703_p4 = por %p702_p1, %p701_p2 }
 0x15a   : > { %p704_p6 = pnand %p703_p4, %p697_p5 }
 0x15c   : > { %707 = shalt.err (!%p704_p6)
}
 0x15d   : > { %563 = dma.vmem_to_hbm [thread:$0]  (%p894_p12), %s965_s25, 256, %s963_s8, %s359_s9   ;;  %v325_v58 = vadd.f32 %v324_v54, %v313_v53  ;;  %v338_v59 = vrot.slane %v331_v55, 4  ;;  %v344_v60 = vlaneseq  ;;  %v320_v61 = vrot.slane %v319_v56, 2 }
 0x15e   : > { %v333_v62 = vadd.f32 %v332_v57, %v330_v52  ;;  %s211_s25 = scalar_lea.vmem [#allocation8], %s513_s18  ;;  %s996_s9 = scalar_lea.hbm %s1042_s3, %s523_s20 }
 0x15f   : > { %v326_v63 = vrot.slane %v325_v58, 2  ;;  %v339_v0 = vadd.f32 %v338_v59, %v331_v55  ;;  %v321_v1 = vadd.f32 %v320_v61, %v319_v56  ;;  %v345_v5 = vshrl.u32 %v344_v60, 7  ;;  %s392_s26 = sshll.u32 %s211_s25, 4  ;;  %s364_s18 = scalar_lea.sflag [#allocation9], %s939_s30  ;;  %s998_s26 = int_to_ptr.vmem [resolvable:$true] %s392_s26 }
 0x160   : > { %v334_v2 = vrot.slane %v333_v62, 2  ;;  %s708_s10 = scalar_lea.vmem %s998_s26, 256  ;;  %s790_s16 = smov [#allocation8]  }
 0x161   : > { %v327_v3 = vadd.f32 %v326_v63, %v325_v58  ;;  %v340_v4 = vrot.slane %v339_v0, 2  ;;  %v322_v7 = vrot.slane %v321_v1, 1  ;;  %vm347_vm0 = vcmp.eq.s32.totalorder %v345_v5, 1  ;;  %p709_p8 = scmp.ne.s32.totalorder %s998_s26, %s708_s10  ;;  %s712_s11 = sshll.u32 %s790_s16, 4  ;;  %s713_s11 = int_to_ptr.vmem [resolvable:$false] %s712_s11 }
 0x162   : > { %v335_v6 = vadd.f32 %v334_v2, %v333_v62  ;;  %vm346_vm1 = vcmp.eq.s32.totalorder %v345_v5, 0  ;;  %s714_s27 = scalar_lea.vmem %s713_s11, 512  ;;  %p715_p7 = scmp.lt.s32.totalorder %s998_s26, %s713_s11 }
 0x163   : > { %v341_v8 = vadd.f32 %v340_v4, %v339_v0  ;;  %v328_v10 = vrot.slane %v327_v3, 1  ;;  %v323_v13 = vadd.f32 %v322_v7, %v321_v1  ;;  %p710_p13 = pnand %p709_p8, %p894_p12  ;;  %p716_p9 = scmp.lt.s32.totalorder %s714_s27, %s708_s10 }
 0x164   : > { %v336_v9 = vrot.slane %v335_v6, 1 }
 0x165   : > { %v342_v11 = vrot.slane %v341_v8, 1  ;;  %v329_v15 = vadd.f32 %v328_v10, %v327_v3  ;;  %p711_p3 = pneg %p710_p13  ;;  %p717_p11 = por %p716_p9, %p715_p7 }
 0x166   : > { %v337_v12 = vadd.f32 %v336_v9, %v335_v6 }
 0x167   : > { %v343_v14 = vadd.f32 %v342_v11, %v341_v8  ;;  %p718_p5 = pnand %p717_p11, %p711_p3 }
 0x168   : > { %v350_v16 = vsel %vm347_vm0, %v337_v12, 0.0 }
 0x169   : > { %v351_v17 = vsel %vm347_vm0, %v343_v14, 0.0  ;;  %v354_v18 = vsel %vm346_vm1, %v323_v13, %v350_v16 }
 0x16a   : > { %v355_v19 = vsel %vm346_vm1, %v329_v15, %v351_v17  ;;  %356 = vst [vmem:[%s211_s25] sm:$0xff] %v354_v18 }
 0x16b   : > { %357 = vst [vmem:[%s211_s25 + $0x8] sm:$0xff] %v355_v19 }
 0x16c   : > { %721 = shalt.err (!%p718_p5)
}
 0x16d   : > { %s722_s30 = scalar_lea.hbm %s996_s9, 256  ;;  %s726_s29 = scalar_lea.hbm %s1042_s3, 768 }
 0x16e   : > { %p723_p0 = scmp.ne.s32.totalorder %s996_s9, %s722_s30  ;;  %p727_p1 = scmp.lt.u32.totalorder %s996_s9, %s1042_s3 }
 0x16f   : > { %p728_p4 = scmp.lt.u32.totalorder %s726_s29, %s722_s30  ;;  %p730_p8 = scmp.lt.u32.totalorder %s722_s30, %s996_s9 }
 0x170   : > { %p724_p10 = pnand %p723_p0, %p894_p12 }
 0x171   : > { %p729_p6 = por %p728_p4, %p727_p1 }
 0x172   : > { %p725_p2 = pneg %p724_p10 }
 0x173   : > { %p731_p13 = por %p730_p8, %p729_p6 }
 0x175   : > { %p732_p3 = pnand %p731_p13, %p725_p2 }
 0x177   : > { %735 = shalt.err (!%p732_p3)
}
 0x178   : > { %564 = dma.vmem_to_hbm [thread:$0]  (%p894_p12), %s998_s26, 256, %s996_s9, %s364_s18  }
 0x179 PF: > { %p585_p7 = scmp.ge.s32.totalorder %s782_s15, 2  ;;  %s404_s6 = sand.u32 1, %s770_s12  }
 0x17a   : > { %p1057_p9 = scmp.ne.s32.totalorder %s1047_s19, 0  ;;  %s405_s7 = scalar_lea.sflag [#allocation4], %s404_s6 }
 0x17c   : > { %p576_p11 = pnand %p585_p7, %p1057_p9 }
 0x17e   : > { %761 = dma.done.wait (!%p576_p11), %s405_s7, 256  }
 0x17f   : > { %763 = vsyncadd (!%p576_p11), %s405_s7, 4294967040  ;;  %s414_s4 = scalar_lea.sflag [#allocation9], %s404_s6 }
 0x180   : > { %765 = dma.done.wait (!%p576_p11), %s414_s4, 256  }
 0x181   : > { %767 = vsyncadd (!%p576_p11), %s414_s4, 4294967040  ;;  %p21_p12 = scmp.ge.s32.totalorder %s864_s24, 5   ;;  %s1058_s12 = smov %s774_s13 }
 0x182   : > { %s1059_s13 = smov %s778_s14  ;;  %s1060_s14 = smov %s890_s17 }
 0x183   : > { %s1061_s15 = smov %s864_s24  ;;  %23 = sbr.rel (!%p21_p12) target bundleno = 8 (0x8), region = 94 }
 0x18a   :  { %419 = vsyncpa [#allocation3], 1 }
 0x18b   :  { %421 = vsyncpa [#allocation3 + $0x1], 1 }
 0x18c   :  { %422 = vsyncpa [#allocation6], 1 }
 0x18d   :  { %423 = vsyncpa [#allocation4], 1 }
 0x18e   :  { %425 = vsyncpa [#allocation4 + $0x1], 1 }
 0x18f   :  { %426 = vsyncpa [#allocation9], 1 }
 0x190   :  { %428 = vsyncpa [#allocation9 + $0x1], 1 }

// kernel: tpu_custom_call.1
= control target key start
LH: loop header
LB: loop body
LE: loop exit
PB: predicated region body
PF: predicated region fallthrough
CT: control target
= control target key end

     0   :  { %9 = vsyncpa [#allocation3], 0  ;;  %s1039_s0 = inlined_call_operand.hbm [shape: f32[24,128], index: 0, kind: input, shape index: {}]   ;;  %s1040_s1 = inlined_call_operand.hbm [shape: f32[128,256], index: 1, kind: input, shape index: {}]   ;;  %s1041_s2 = inlined_call_operand.hbm [shape: f32[24,256], index: 2, kind: output, shape index: {0}]   ;;  %s1042_s3 = inlined_call_operand.hbm [shape: f32[3,8,256], index: 3, kind: output, shape index: {1}]  }
   0x1   :  { %11 = vsyncpa [#allocation3 + $0x1], 0 }
   0x2   :  { %12 = vsyncpa [#allocation6], 0 }
   0x3   :  { %13 = vsyncpa [#allocation4], 0 }
   0x4   :  { %15 = vsyncpa [#allocation4 + $0x1], 0 }
   0x5   :  { %16 = vsyncpa [#allocation9], 0 }
   0x6   :  { %18 = vsyncpa [#allocation9 + $0x1], 0  ;;  %s811_s12 = smov 0   ;;  %s813_s13 = smov 0  }
   0x7   :  { %s815_s14 = smov 0   ;;  %s817_s15 = smov 0  }
   0x8 LB: > { %s832_s16 = sadd.s32 4294967295, %s782_s15   ;;  %s504_s17 = sadd.s32 4294967294, %s782_s15   ;;  %s782_s15 = sphi %s817_s15, %s1061_s15   ;;  %s778_s14 = sphi %s815_s14, %s1060_s14   ;;  %s774_s13 = sphi %s813_s13, %s1059_s13   ;;  %s770_s12 = sphi %s811_s12, %s1058_s12  }
   0x9   : > { %p44_p0 = scmp.ne.s32.totalorder %s774_s13, %s770_s12  ;;  %p1043_p1 = scmp.eq.s32.totalorder %s832_s16, 0 }
   0xa   : > { %p95_p3 = scmp.eq.s32.totalorder %s504_s17, 2  ;;  %p505_p5 = scmp.ge.s32.totalorder %s782_s15, 1 }
   0xb   : > { %p841_p4 = por %p1043_p1, %p44_p0  ;;  %p128_p7 = scmp.lt.s32.totalorder %s782_s15, 4 }
   0xc   : > { %p846_p6 = por %p95_p3, %p44_p0  ;;  %s784_s21 = smov [#allocation5]  }
   0xd   : > { %s1046_s18 = scalar_select %p841_p4, 1, 0 }
   0xe   : > { %s1047_s19 = scalar_select %p846_p6, 1, 0 }
   0xf   : > { %p851_p8 = pnand %p505_p5, %p128_p7  ;;  %s140_s22 = sshll.u32 %s784_s21, 4  ;;  %s141_s22 = int_to_ptr.vmem [resolvable:$true] %s140_s22 }
  0x10   : > { %s864_s24 = sadd.s32 1, %s782_s15   ;;  %s31_s25 = sadd.s32 1, %s778_s14 }
  0x11   : > { %s1048_s20 = scalar_select %p851_p8, 1, 0 }
  0x12   : > { %p567_p9 = pneg %p851_p8  ;;  %s28_s26 = ssub.s32 %s782_s15, %s864_s24 }
  0x13   : > { %s622_s29 = scalar_lea.hbm %s1040_s1, 4096 }
  0x14   : > { %p859_p10 = pnand %p567_p9, %p1043_p1  ;;  %p623_p11 = scmp.ne.s32.totalorder %s1040_s1, %s622_s29 }
  0x15   : > { %p629_p3 = scmp.lt.u32.totalorder %s622_s29, %s1040_s1 }
  0x16   : > { %p624_p12 = pneg %p859_p10 }
  0x18   : > { %p625_p13 = pnand %p624_p12, %p623_p11 }
  0x1a   : > { %p626_p0 = pneg %p625_p13 }
  0x1c   : > { %p631_p5 = pnand %p629_p3, %p626_p0 }
  0x1e   : > { %634 = shalt.err (!%p631_p5)
}
  0x1f   : > { %s635_s7 = scalar_lea.vmem %s141_s22, 4096  ;;  %p643_p2 = scmp.lt.s32.totalorder %s141_s22, %s141_s22 }
  0x20   : > { %p636_p7 = scmp.ne.s32.totalorder %s141_s22, %s635_s7  ;;  %p644_p6 = scmp.lt.s32.totalorder %s635_s7, %s635_s7 }
  0x22   : > { %p638_p9 = pnand %p636_p7, %p624_p12  ;;  %p645_p4 = por %p644_p6, %p643_p2 }
  0x24   : > { %p639_p1 = pneg %p638_p9 }
  0x26   : > { %p646_p8 = pnand %p645_p4, %p639_p1 }
  0x28   : > { %649 = shalt.err (!%p646_p8)
}
  0x29   : > { %s785_s8 = smov 256   ;;  %s786_s9 = smov 16  }
  0x2a   : > { %570 = dma.hbm_to_vmem [thread:$0]  (!%p859_p10), %s1040_s1, 4096, %s141_s22, [#allocation6], %s785_s8, %s785_s8, %s786_s9  }
  0x2b   : > { %p29_p11 = scmp.eq.s32.totalorder %s28_s26, 0  ;;  %p38_p2 = scmp.ne.s32.totalorder %s778_s14, %s774_s13 }
  0x2c   : > { %p39_p1 = scmp.eq.s32.totalorder %s782_s15, 0  ;;  %p583_p4 = scmp.lt.s32.totalorder %s782_s15, 3 }
  0x2d   : > { %s890_s17 = scalar_select %p29_p11, %s778_s14, %s31_s25  }
  0x2e   : > { %p40_p6 = por %p39_p1, %p38_p2  ;;  %p1050_p8 = scmp.eq.s32.totalorder %s832_s16, 2 }
  0x2f   : > { %s154_s27 = sand.u32 1, %s778_s14   ;;  %s509_s28 = sshll.u32 %s782_s15, 7 }
  0x30   : > { %p894_p12 = por %p1050_p8, %p38_p2  ;;  %s508_s29 = sshll.u32 %s154_s27, 3 }
  0x31   : > { %s903_s4 = scalar_lea.hbm %s1039_s0, %s509_s28  ;;  %s158_s22 = scalar_lea.vmem [#allocation2], %s508_s29 }
  0x32   : > { %s165_s25 = sshll.u32 %s158_s22, 4  ;;  %p905_p10 = pnand %p583_p4, %p40_p6  ;;  %s909_s25 = int_to_ptr.vmem [resolvable:$true] %s165_s25 }
  0x33   : > { %s155_s5 = scalar_lea.sflag [#allocation3], %s154_s27  ;;  %s650_s6 = scalar_lea.hbm %s903_s4, 128 }
  0x34   : > { %p651_p13 = scmp.ne.s32.totalorder %s903_s4, %s650_s6  ;;  %p652_p0 = pneg %p905_p10 }
  0x35   : > { %s655_s9 = scalar_lea.hbm %s1039_s0, 384  ;;  %p656_p7 = scmp.lt.u32.totalorder %s903_s4, %s1039_s0 }
  0x36   : > { %p653_p3 = pnand %p652_p0, %p651_p13  ;;  %p657_p9 = scmp.lt.u32.totalorder %s655_s9, %s650_s6 }
  0x37   : > { %p659_p2 = scmp.lt.u32.totalorder %s650_s6, %s903_s4 }
  0x38   : > { %p654_p5 = pneg %p653_p3  ;;  %p658_p11 = por %p657_p9, %p656_p7 }
  0x3a   : > { %p660_p1 = por %p659_p2, %p658_p11 }
  0x3c   : > { %p661_p4 = pnand %p660_p1, %p654_p5 }
  0x3e   : > { %664 = shalt.err (!%p661_p4)
}
  0x3f   : > { %s665_s27 = scalar_lea.vmem %s909_s25, 128  ;;  %s787_s28 = smov [#allocation2]  }
  0x40   : > { %p666_p6 = scmp.ne.s32.totalorder %s909_s25, %s665_s27  ;;  %s670_s29 = sshll.u32 %s787_s28, 4  ;;  %s671_s29 = int_to_ptr.vmem [resolvable:$false] %s670_s29 }
  0x41   : > { %s672_s23 = scalar_lea.vmem %s671_s29, 256  ;;  %p673_p3 = scmp.lt.s32.totalorder %s909_s25, %s671_s29 }
  0x42   : > { %p668_p8 = pnand %p666_p6, %p652_p0  ;;  %p674_p7 = scmp.lt.s32.totalorder %s672_s23, %s665_s27 }
  0x44   : > { %p669_p13 = pneg %p668_p8  ;;  %p675_p9 = por %p674_p7, %p673_p3 }
  0x46   : > { %p676_p11 = pnand %p675_p9, %p669_p13 }
  0x48   : > { %679 = shalt.err (!%p676_p11)
}
  0x49   : > { %574 = dma.hbm_to_vmem [thread:$0]  (!%p905_p10), %s903_s4, 128, %s909_s25, %s155_s5  }
  0x4a   : > { %p1053_p5 = scmp.ne.s32.totalorder %s1048_s20, 0 }
  0x4b   : > { %s939_s30 = sand.u32 (!%p1053_p5), 1, %s774_s13   ;;  %p1054_p0 = scmp.ne.s32.totalorder (!%p1053_p5), %s1046_s18, 0 }
  0x4c   : > { %174 = sbr.rel (%p1053_p5) target bundleno = 377 (0x179), region = 28  ;;  %s511_s22 = sshll.u32 (!%p1053_p5), %s939_s30, 3 }
  0x4d   : > { %s177_s6 = scalar_lea.sflag (!%p1053_p5), [#allocation3], %s939_s30  ;;  %s943_s7 = scalar_lea.vmem (!%p1053_p5), [#allocation2], %s511_s22 }
  0x53   : > { %753 = dma.done.wait (%p1054_p0), %s177_s6, 128  }
  0x54   : > { %755 = vsyncadd (%p1054_p0), %s177_s6, 4294967168  ;;  %p1055_p10 = scmp.eq.s32.totalorder %s832_s16, 0 }
  0x56   : > { %757 = dma.done.wait (%p1055_p10), [#allocation6], 4096   ;;  %p1056_p2 = pmov %p1055_p10 }
  0x57   : > { %v788_v0 = vmov 0.0   ;;  %v214_v1 = vld [vmem:[#allocation5 + $0x8] sm:$0xff]  ;;  %v216_v2 = vld [vmem:[#allocation5 + $0x18] sm:$0xff]  ;;  %v213_v3 = vld [vmem:[#allocation5] sm:$0xff]  ;;  %s513_s18 = sshll.u32 %s939_s30, 4  ;;  %s523_s20 = sshll.u32 %s832_s16, 8 }
  0x58   : > { %759 = vsyncadd (%p1056_p2), [#allocation6], 4294963200  ;;  %309 = vmatprep.mubr.f32.mxu0 %v788_v0  ;;  %v525_v4 = vpack.c.bf16 %v216_v2, %v214_v1  ;;  %v215_v5 = vld [vmem:[#allocation5 + $0x10] sm:$0xff]  ;;  %v218_v6 = vld [vmem:[#allocation5 + $0x28] sm:$0xff]  ;;  %s204_s4 = scalar_lea.vmem [#allocation7], %s513_s18  ;;  %s963_s8 = scalar_lea.hbm %s1041_s2, %s523_s20 }
  0x59   : > { %v220_v7 = vld [vmem:[#allocation5 + $0x38] sm:$0xff]  ;;  %v527_v8 = vpack.c.bf16 %v215_v5, %v213_v3  ;;  %v217_v10 = vld [vmem:[#allocation5 + $0x20] sm:$0xff]  ;;  %v219_v11 = vld [vmem:[#allocation5 + $0x30] sm:$0xff]  ;;  %s378_s25 = sshll.u32 %s204_s4, 4  ;;  %s359_s9 = scalar_lea.sflag [#allocation4], %s939_s30  ;;  %s965_s25 = int_to_ptr.vmem [resolvable:$true] %s378_s25 }
  0x5a   : > { %v529_v9 = vpack.c.bf16 %v220_v7, %v218_v6  ;;  %v222_v12 = vld [vmem:[#allocation5 + $0x48] sm:$0xff]  ;;  %526 = vmatprep.subr.bf16.mxu0 %v525_v4  ;;  %v224_v13 = vld [vmem:[#allocation5 + $0x58] sm:$0xff]  ;;  %v531_v14 = vpack.c.bf16 %v219_v11, %v217_v10  ;;  %v221_v16 = vld [vmem:[#allocation5 + $0x40] sm:$0xff]  ;;  %s680_s10 = scalar_lea.vmem %s965_s25, 256  ;;  %s789_s11 = smov [#allocation7]  }
  0x5b   : > { %528 = vmatpush1.bf16.msra.mxu0 %v527_v8  ;;  %v533_v15 = vpack.c.bf16 %v224_v13, %v222_v12  ;;  %v223_v17 = vld [vmem:[#allocation5 + $0x50] sm:$0xff]  ;;  %v226_v18 = vld [vmem:[#allocation5 + $0x68] sm:$0xff]  ;;  %v228_v19 = vld [vmem:[#allocation5 + $0x78] sm:$0xff]  ;;  %p681_p1 = scmp.ne.s32.totalorder %s965_s25, %s680_s10  ;;  %s684_s27 = sshll.u32 %s789_s11, 4  ;;  %s685_s27 = int_to_ptr.vmem [resolvable:$false] %s684_s27 }
  0x5c   : > { %530 = vmatprep.subr.bf16.mxu0 %v529_v9  ;;  %v535_v20 = vpack.c.bf16 %v223_v17, %v221_v16  ;;  %v537_v21 = vpack.c.bf16 %v228_v19, %v226_v18  ;;  %v225_v22 = vld [vmem:[#allocation5 + $0x60] sm:$0xff]  ;;  %v227_v23 = vld [vmem:[#allocation5 + $0x70] sm:$0xff]  ;;  %v230_v24 = vld [vmem:[#allocation5 + $0x88] sm:$0xff]  ;;  %s686_s28 = scalar_lea.vmem %s685_s27, 512  ;;  %p687_p8 = scmp.lt.s32.totalorder %s965_s25, %s685_s27 }
  0x5d   : > { %v232_v25 = vld [vmem:[#allocation5 + $0x98] sm:$0xff]  ;;  %v539_v26 = vpack.c.bf16 %v227_v23, %v225_v22  ;;  %v229_v28 = vld [vmem:[#allocation5 + $0x80] sm:$0xff]  ;;  %v231_v29 = vld [vmem:[#allocation5 + $0x90] sm:$0xff]  ;;  %p682_p4 = pnand %p681_p1, %p894_p12  ;;  %p688_p13 = scmp.lt.s32.totalorder %s686_s28, %s680_s10 }
  0x5e   : > { %v541_v27 = vpack.c.bf16 %v232_v25, %v230_v24  ;;  %v234_v30 = vld [vmem:[#allocation5 + $0xa8] sm:$0xff]  ;;  %v236_v31 = vld [vmem:[#allocation5 + $0xb8] sm:$0xff]  ;;  %v543_v32 = vpack.c.bf16 %v231_v29, %v229_v28  ;;  %v233_v34 = vld [vmem:[#allocation5 + $0xa0] sm:$0xff] }
  0x5f   : > { %532 = vmatpush1.bf16.msra.mxu0 %v531_v14  ;;  %v545_v33 = vpack.c.bf16 %v236_v31, %v234_v30  ;;  %v235_v35 = vld [vmem:[#allocation5 + $0xb0] sm:$0xff]  ;;  %v238_v36 = vld [vmem:[#allocation5 + $0xc8] sm:$0xff]  ;;  %v240_v37 = vld [vmem:[#allocation5 + $0xd8] sm:$0xff]  ;;  %p683_p6 = pneg %p682_p4  ;;  %p689_p3 = por %p688_p13, %p687_p8 }
  0x60   : > { %534 = vmatprep.subr.bf16.mxu0 %v533_v15  ;;  %v547_v38 = vpack.c.bf16 %v235_v35, %v233_v34  ;;  %v549_v39 = vpack.c.bf16 %v240_v37, %v238_v36  ;;  %v237_v40 = vld [vmem:[#allocation5 + $0xc0] sm:$0xff]  ;;  %v239_v41 = vld [vmem:[#allocation5 + $0xd0] sm:$0xff]  ;;  %v242_v42 = vld [vmem:[#allocation5 + $0xe8] sm:$0xff] }
  0x61   : > { %v244_v43 = vld [vmem:[#allocation5 + $0xf8] sm:$0xff]  ;;  %v551_v44 = vpack.c.bf16 %v239_v41, %v237_v40  ;;  %v241_v46 = vld [vmem:[#allocation5 + $0xe0] sm:$0xff]  ;;  %v243_v47 = vld [vmem:[#allocation5 + $0xf0] sm:$0xff]  ;;  %p690_p7 = pnand %p689_p3, %p683_p6 }
  0x62   : > { %v553_v45 = vpack.c.bf16 %v244_v43, %v242_v42  ;;  %v555_v48 = vpack.c.bf16 %v243_v47, %v241_v46  ;;  %v212_v49 = vld [vmem:[%s943_s7] sm:$0xff] }
  0x63   : > { %536 = vmatpush1.bf16.msra.mxu0 %v535_v20 }
  0x64   : > { %538 = vmatprep.subr.bf16.mxu0 %v537_v21 }
  0x67   : > { %540 = vmatpush1.bf16.msra.mxu0 %v539_v26 }
  0x68   : > { %542 = vmatprep.subr.bf16.mxu0 %v541_v27 }
  0x6b   : > { %544 = vmatpush1.bf16.msra.mxu0 %v543_v32 }
  0x6c   : > { %546 = vmatprep.subr.bf16.mxu0 %v545_v33 }
  0x6f   : > { %548 = vmatpush1.bf16.msra.mxu0 %v547_v38 }
  0x70   : > { %550 = vmatprep.subr.bf16.mxu0 %v549_v39 }
  0x73   : > { %552 = vmatpush1.bf16.msra.mxu0 %v551_v44 }
  0x74   : > { %554 = vmatprep.subr.bf16.mxu0 %v553_v45 }
  0x77   : > { %556 = vmatpush1.bf16.msra.mxu0 %v555_v48 }
  0x7a   : > { %310 = vmatmul.mubr.f32.vlgmr.msra.gmra.mrb[0].mxu0 %v212_v49 }
 0x14d   : > { %v311_v50 = vpop.f32.mrb[0].mxu0 }
 0x14e   : > { %316 = vst [vmem:[%s204_s4] sm:$0xff] %v311_v50  ;;  %v318_v51 = vrot.slane %v311_v50, 4  ;;  %v330_v52 = vmul.f32 %v311_v50, %v311_v50  ;;  %v313_v53 = vpop.f32.mrb[1].mxu0 }
 0x14f   : > { %317 = vst [vmem:[%s204_s4 + $0x8] sm:$0xff] %v313_v53  ;;  %v324_v54 = vrot.slane %v313_v53, 4  ;;  %v331_v55 = vmul.f32 %v313_v53, %v313_v53 }
 0x150   : > { %v319_v56 = vadd.f32 %v318_v51, %v311_v50  ;;  %v332_v57 = vrot.slane %v330_v52, 4 }
 0x151   : > { %693 = shalt.err (!%p690_p7)
}
 0x152   : > { %s694_s29 = scalar_lea.hbm %s963_s8, 256  ;;  %s698_s6 = scalar_lea.hbm %s1041_s2, 768 }
 0x153   : > { %p695_p9 = scmp.ne.s32.totalorder %s963_s8, %s694_s29  ;;  %p699_p0 = scmp.lt.u32.totalorder %s963_s8, %s1041_s2 }
 0x154   : > { %p700_p10 = scmp.lt.u32.totalorder %s698_s6, %s694_s29  ;;  %p702_p1 = scmp.lt.u32.totalorder %s694_s29, %s963_s8 }
 0x155   : > { %p696_p11 = pnand %p695_p9, %p894_p12 }
 0x156   : > { %p701_p2 = por %p700_p10, %p699_p0 }
 0x157   : > { %p697_p5 = pneg %p696_p11 }
 0x158   : > { %p703_p4 = por %p702_p1, %p701_p2 }
 0x15a   : > { %p704_p6 = pnand %p703_p4, %p697_p5 }
 0x15c   : > { %707 = shalt.err (!%p704_p6)
}
 0x15d   : > { %563 = dma.vmem_to_hbm [thread:$0]  (%p894_p12), %s965_s25, 256, %s963_s8, %s359_s9   ;;  %v325_v58 = vadd.f32 %v324_v54, %v313_v53  ;;  %v338_v59 = vrot.slane %v331_v55, 4  ;;  %v344_v60 = vlaneseq  ;;  %v320_v61 = vrot.slane %v319_v56, 2 }
 0x15e   : > { %v333_v62 = vadd.f32 %v332_v57, %v330_v52  ;;  %s211_s25 = scalar_lea.vmem [#allocation8], %s513_s18  ;;  %s996_s9 = scalar_lea.hbm %s1042_s3, %s523_s20 }
 0x15f   : > { %v326_v63 = vrot.slane %v325_v58, 2  ;;  %v339_v0 = vadd.f32 %v338_v59, %v331_v55  ;;  %v321_v1 = vadd.f32 %v320_v61, %v319_v56  ;;  %v345_v5 = vshrl.u32 %v344_v60, 7  ;;  %s392_s26 = sshll.u32 %s211_s25, 4  ;;  %s364_s18 = scalar_lea.sflag [#allocation9], %s939_s30  ;;  %s998_s26 = int_to_ptr.vmem [resolvable:$true] %s392_s26 }
 0x160   : > { %v334_v2 = vrot.slane %v333_v62, 2  ;;  %s708_s10 = scalar_lea.vmem %s998_s26, 256  ;;  %s790_s16 = smov [#allocation8]  }
 0x161   : > { %v327_v3 = vadd.f32 %v326_v63, %v325_v58  ;;  %v340_v4 = vrot.slane %v339_v0, 2  ;;  %v322_v7 = vrot.slane %v321_v1, 1  ;;  %vm347_vm0 = vcmp.eq.s32.totalorder %v345_v5, 1  ;;  %p709_p8 = scmp.ne.s32.totalorder %s998_s26, %s708_s10  ;;  %s712_s11 = sshll.u32 %s790_s16, 4  ;;  %s713_s11 = int_to_ptr.vmem [resolvable:$false] %s712_s11 }
 0x162   : > { %v335_v6 = vadd.f32 %v334_v2, %v333_v62  ;;  %vm346_vm1 = vcmp.eq.s32.totalorder %v345_v5, 0  ;;  %s714_s27 = scalar_lea.vmem %s713_s11, 512  ;;  %p715_p7 = scmp.lt.s32.totalorder %s998_s26, %s713_s11 }
 0x163   : > { %v341_v8 = vadd.f32 %v340_v4, %v339_v0  ;;  %v328_v10 = vrot.slane %v327_v3, 1  ;;  %v323_v13 = vadd.f32 %v322_v7, %v321_v1  ;;  %p710_p13 = pnand %p709_p8, %p894_p12  ;;  %p716_p9 = scmp.lt.s32.totalorder %s714_s27, %s708_s10 }
 0x164   : > { %v336_v9 = vrot.slane %v335_v6, 1 }
 0x165   : > { %v342_v11 = vrot.slane %v341_v8, 1  ;;  %v329_v15 = vadd.f32 %v328_v10, %v327_v3  ;;  %p711_p3 = pneg %p710_p13  ;;  %p717_p11 = por %p716_p9, %p715_p7 }
 0x166   : > { %v337_v12 = vadd.f32 %v336_v9, %v335_v6 }
 0x167   : > { %v343_v14 = vadd.f32 %v342_v11, %v341_v8  ;;  %p718_p5 = pnand %p717_p11, %p711_p3 }
 0x168   : > { %v350_v16 = vsel %vm347_vm0, %v337_v12, 0.0 }
 0x169   : > { %v351_v17 = vsel %vm347_vm0, %v343_v14, 0.0  ;;  %v354_v18 = vsel %vm346_vm1, %v323_v13, %v350_v16 }
 0x16a   : > { %v355_v19 = vsel %vm346_vm1, %v329_v15, %v351_v17  ;;  %356 = vst [vmem:[%s211_s25] sm:$0xff] %v354_v18 }
 0x16b   : > { %357 = vst [vmem:[%s211_s25 + $0x8] sm:$0xff] %v355_v19 }
 0x16c   : > { %721 = shalt.err (!%p718_p5)
}
 0x16d   : > { %s722_s30 = scalar_lea.hbm %s996_s9, 256  ;;  %s726_s29 = scalar_lea.hbm %s1042_s3, 768 }
 0x16e   : > { %p723_p0 = scmp.ne.s32.totalorder %s996_s9, %s722_s30  ;;  %p727_p1 = scmp.lt.u32.totalorder %s996_s9, %s1042_s3 }
 0x16f   : > { %p728_p4 = scmp.lt.u32.totalorder %s726_s29, %s722_s30  ;;  %p730_p8 = scmp.lt.u32.totalorder %s722_s30, %s996_s9 }
 0x170   : > { %p724_p10 = pnand %p723_p0, %p894_p12 }
 0x171   : > { %p729_p6 = por %p728_p4, %p727_p1 }
 0x172   : > { %p725_p2 = pneg %p724_p10 }
 0x173   : > { %p731_p13 = por %p730_p8, %p729_p6 }
 0x175   : > { %p732_p3 = pnand %p731_p13, %p725_p2 }
 0x177   : > { %735 = shalt.err (!%p732_p3)
}
 0x178   : > { %564 = dma.vmem_to_hbm [thread:$0]  (%p894_p12), %s998_s26, 256, %s996_s9, %s364_s18  }
 0x179 PF: > { %p585_p7 = scmp.ge.s32.totalorder %s782_s15, 2  ;;  %s404_s6 = sand.u32 1, %s770_s12  }
 0x17a   : > { %p1057_p9 = scmp.ne.s32.totalorder %s1047_s19, 0  ;;  %s405_s7 = scalar_lea.sflag [#allocation4], %s404_s6 }
 0x17c   : > { %p576_p11 = pnand %p585_p7, %p1057_p9 }
 0x17e   : > { %761 = dma.done.wait (!%p576_p11), %s405_s7, 256  }
 0x17f   : > { %763 = vsyncadd (!%p576_p11), %s405_s7, 4294967040  ;;  %s414_s4 = scalar_lea.sflag [#allocation9], %s404_s6 }
 0x180   : > { %765 = dma.done.wait (!%p576_p11), %s414_s4, 256  }
 0x181   : > { %767 = vsyncadd (!%p576_p11), %s414_s4, 4294967040  ;;  %p21_p12 = scmp.ge.s32.totalorder %s864_s24, 5   ;;  %s1058_s12 = smov %s774_s13 }
 0x182   : > { %s1059_s13 = smov %s778_s14  ;;  %s1060_s14 = smov %s890_s17 }
 0x183   : > { %s1061_s15 = smov %s864_s24  ;;  %23 = sbr.rel (!%p21_p12) target bundleno = 8 (0x8), region = 94 }
 0x18a   :  { %419 = vsyncpa [#allocation3], 1 }
 0x18b   :  { %421 = vsyncpa [#allocation3 + $0x1], 1 }
 0x18c   :  { %422 = vsyncpa [#allocation6], 1 }
 0x18d   :  { %423 = vsyncpa [#allocation4], 1 }
 0x18e   :  { %425 = vsyncpa [#allocation4 + $0x1], 1 }
 0x18f   :  { %426 = vsyncpa [#allocation9], 1 }
 0x190   :  { %428 = vsyncpa [#allocation9 + $0x1], 1 }

</bundles_post_ra>
